<compile_context>
chip_gen: v7x
topology: tpu7x:2x2x1
jax: 0.10.0
libtpu: 0.0.40
codegen_flags: <defaults>
</compile_context>

<pallas_src>
import math

import jax
import jax.numpy as jnp
from jax.experimental import pallas as pl
from jax.experimental.pallas import tpu as pltpu


def _make_mha_kernel(T, d_in, d_out, num_heads, tq, compute_dtype):
    head_dim = d_out // num_heads

    def kernel(x_ref, wqkv_ref, wproj_ref, bproj_ref, o_ref, qkv_scratch):
        # x_ref:       (1, T, d_in)        full sequence of the current batch element
        # wqkv_ref:    (d_in, 3*d_out)     fused qkv.weight.T, scale folded into Q cols
        # wproj_ref:   (d_out, d_out)      proj.weight.T
        # bproj_ref:   (1, d_out)          proj.bias (f32)
        # o_ref:       (1, tq, d_out)      current query tile of the output
        # qkv_scratch: (T, 3*d_out)        fused QKV activations, cached per batch elem
        qi = pl.program_id(1)

        # ---- fused QKV projection: computed once per batch element (q-tile 0) ----
        @pl.when(qi == 0)
        def _():
            x = x_ref[0]                                           # (T, d_in)
            qkv = jnp.dot(x, wqkv_ref[...],
                          preferred_element_type=jnp.float32)      # (T, 3*d_out) f32
            qkv_scratch[...] = qkv.astype(compute_dtype)

        q_start = pl.multiple_of(qi * tq, tq)

        # ---- causal mask for this query tile, generated in-kernel ----
        row_ids = q_start + jax.lax.broadcasted_iota(jnp.int32, (tq, T), 0)
        col_ids = jax.lax.broadcasted_iota(jnp.int32, (tq, T), 1)
        masked = col_ids > row_ids          # True = strictly-future key = masked out

        # ---- per-head attention; heads are small & static -> unrolled loop ----
        ctx_heads = []
        for h in range(num_heads):
            c0 = h * head_dim
            q_h = qkv_scratch[pl.ds(q_start, tq), pl.ds(c0, head_dim)]            # (tq, hd)
            k_h = qkv_scratch[:, pl.ds(d_out + c0, head_dim)]                     # (T, hd)
            v_h = qkv_scratch[:, pl.ds(2 * d_out + c0, head_dim)]                 # (T, hd)

            # scores (scale already folded into the Q weights)
            s = jax.lax.dot_general(q_h, k_h, (((1,), (1,)), ((), ())),
                                    preferred_element_type=jnp.float32)           # (tq, T)
            s = jnp.where(masked, jnp.float32(-1e30), s)

            # numerically stable softmax over keys, kept in f32 (v5e-safe)
            m = jnp.max(s, axis=-1, keepdims=True)
            e = jnp.exp(s - m)
            denom = jnp.sum(e, axis=-1, keepdims=True)       # >= 1 (diagonal attends)
            p = e * pl.reciprocal(denom, approx=True)        # divide on the EUP slot

            ctx_heads.append(
                jnp.dot(p.astype(compute_dtype), v_h,
                        preferred_element_type=jnp.float32))                      # (tq, hd)

        # ---- single full-width output projection over the concatenated heads ----
        ctx = jnp.concatenate(ctx_heads, axis=-1)                                 # (tq, d_out)
        out = jnp.dot(ctx.astype(compute_dtype), wproj_ref[...],
                      preferred_element_type=jnp.float32)
        out = out + bproj_ref[...]
        o_ref[0] = out.astype(o_ref.dtype)

    return kernel


def mha_sdpa_forward(x, W_qkv, W_proj, b_proj, context_length, num_heads,
                     compute_dtype=jnp.bfloat16, q_tile=128):
    """Forward pass equivalent to MHAPyTorchSDPAWithoutFlash.forward (eval, dropout=0)."""
    B, T, d_in = x.shape
    d_out = W_proj.shape[0]
    head_dim = d_out // num_heads
    assert d_out % num_heads == 0
    # The PyTorch module's mask slicing only type-checks when context_length >= T.
    assert context_length >= T, "context_length must cover num_tokens"

    # --- choose query tile (multiple of 8, divides T; fall back to full T) ---
    tq = T
    for cand in (q_tile, 256, 128, 64, 32, 16, 8):
        if cand < T and T % cand == 0:
            tq = cand
            break
    n_q = T // tq

    # --- parameter reshuffling (plain JAX glue, no compute in the hot path) ---
    scale = 1.0 / math.sqrt(head_dim)
    wqkv_t = W_qkv.T.astype(jnp.float32)                       # (d_in, 3*d_out): y = x @ W.T
    col_scale = jnp.concatenate([jnp.full((d_out,), scale, jnp.float32),
                                 jnp.ones((2 * d_out,), jnp.float32)])
    wqkv_t = (wqkv_t * col_scale[None, :]).astype(compute_dtype)   # fold 1/sqrt(hd) into Wq
    wproj_t = W_proj.T.astype(compute_dtype)                   # (d_out, d_out)
    bproj = b_proj.reshape(1, d_out).astype(jnp.float32)
    x_c = x.astype(compute_dtype)

    kernel = _make_mha_kernel(T, d_in, d_out, num_heads, tq, compute_dtype)

    grid_spec = pltpu.PrefetchScalarGridSpec(
        num_scalar_prefetch=0,
        grid=(B, n_q),
        in_specs=[
            pl.BlockSpec((1, T, d_in), lambda b, q: (b, 0, 0)),        # x (full sequence)
            pl.BlockSpec((d_in, 3 * d_out), lambda b, q: (0, 0)),      # fused qkv weight
            pl.BlockSpec((d_out, d_out), lambda b, q: (0, 0)),         # proj weight
            pl.BlockSpec((1, d_out), lambda b, q: (0, 0)),             # proj bias
        ],
        out_specs=pl.BlockSpec((1, tq, d_out), lambda b, q: (b, q, 0)),
        scratch_shapes=[pltpu.VMEM((T, 3 * d_out), compute_dtype)],
    )

    # Rough per-step VMEM estimate; raise the scoped limit only if needed
    # (keeps headroom for v7x's 64 MiB physical VMEM).
    isz = jnp.dtype(compute_dtype).itemsize
    osz = jnp.dtype(x.dtype).itemsize
    est_bytes = (2 * T * d_in * isz                               # x block (double buffered)
                 + 2 * tq * d_out * osz                           # out block (double buffered)
                 + 2 * (d_in * 3 * d_out + d_out * d_out) * isz   # weights
                 + T * 3 * d_out * isz                            # qkv scratch
                 + 4 * tq * T * 4)                                # score/softmax f32 temporaries
    compiler_kwargs = dict(dimension_semantics=("parallel", "arbitrary"))
    if est_bytes > 24 * 1024 * 1024:
        compiler_kwargs["vmem_limit_bytes"] = int(min(2 * est_bytes, 60 * 1024 * 1024))

    out = pl.pallas_call(
        kernel,
        out_shape=jax.ShapeDtypeStruct((B, T, d_out), x.dtype),
        grid_spec=grid_spec,
        compiler_params=pltpu.CompilerParams(**compiler_kwargs),
    )(x_c, wqkv_t, wproj_t, bproj)
    return out


def _reference(x, W_qkv, W_proj, b_proj, num_heads):
    """Pure-JAX f32 reference with the same (causal) semantics."""
    B, T, d_in = x.shape
    d_out = W_proj.shape[0]
    hd = d_out // num_heads
    qkv = x @ W_qkv.T                                            # (B, T, 3*d_out)
    qkv = qkv.reshape(B, T, 3, num_heads, hd).transpose(2, 0, 3, 1, 4)
    q, k, v = qkv[0], qkv[1], qkv[2]                             # (B, H, T, hd)
    s = jnp.einsum("bhqd,bhkd->bhqk", q, k) / math.sqrt(hd)
    mask = jnp.triu(jnp.ones((T, T), bool), k=1)
    s = jnp.where(mask, -jnp.inf, s)
    p = jax.nn.softmax(s, axis=-1)
    ctx = jnp.einsum("bhqk,bhkd->bhqd", p, v)
    ctx = ctx.transpose(0, 2, 1, 3).reshape(B, T, d_out)
    return ctx @ W_proj.T + b_proj


if __name__ == "__main__":
    # Small, deterministic example consistent with the module's constraints.
    B, T = 2, 8
    d_in = d_out = 64
    num_heads = 4
    context_length = 16          # >= num_tokens, matches the mask[:T, :T] branch
    # dropout=0.0 / eval mode -> dropout is a no-op (not implemented in-kernel).

    key = jax.random.PRNGKey(0)
    k1, k2, k3, k4 = jax.random.split(key, 4)

    # nn.Linear-shaped parameters, deterministic synthetic init (qkv_bias=False).
    W_qkv = jax.random.normal(k1, (3 * d_out, d_in), jnp.float32) / math.sqrt(d_in)
    W_proj = jax.random.normal(k2, (d_out, d_out), jnp.float32) / math.sqrt(d_out)
    b_proj = jax.random.normal(k3, (d_out,), jnp.float32) * 0.01
    x = jax.random.normal(k4, (B, T, d_in), jnp.float32)

    out = mha_sdpa_forward(x, W_qkv, W_proj, b_proj, context_length, num_heads)
    out = jax.block_until_ready(out)

    assert out.shape == (B, T, d_out), out.shape
    assert out.dtype == jnp.float32, out.dtype
    assert bool(jnp.all(jnp.isfinite(out)))

    ref = _reference(x, W_qkv, W_proj, b_proj, num_heads)
    # bf16 matmul operands + approx reciprocal -> loose but meaningful tolerance.
    assert bool(jnp.allclose(out, ref, atol=1e-1, rtol=1e-1)), \
        float(jnp.max(jnp.abs(out - ref)))

    print("KERNEL_OK")
</pallas_src>

<mosaic_0001>
module attributes {stable_mosaic.version = 11 : i64} {
  func.func @kernel(%arg0: i32, %arg1: i32, %arg2: memref<1x8x64xbf16, #tpu.memory_space<vmem>>, %arg3: memref<64x192xbf16, #tpu.memory_space<vmem>>, %arg4: memref<64x64xbf16, #tpu.memory_space<vmem>>, %arg5: memref<1x64xf32, #tpu.memory_space<vmem>>, %arg6: memref<1x8x64xf32, #tpu.memory_space<vmem>>, %arg7: memref<8x192xbf16, #tpu.memory_space<vmem>>) attributes {dimension_semantics = [#tpu.dimension_semantics<parallel>, #tpu.dimension_semantics<arbitrary>], iteration_bounds = array<i64: 2, 1>, scalar_prefetch = 0 : i64, scratch_operands = 1 : i64, tpu.core_type = #tpu.core_type<tc>, window_params = [{transform_indices = @transform_0, window_bounds = array<i64: 1, 8, 64>}, {pipeline_mode = #tpu.pipeline_mode<synchronous>, transform_indices = @transform_1, window_bounds = array<i64: 64, 192>}, {pipeline_mode = #tpu.pipeline_mode<synchronous>, transform_indices = @transform_2, window_bounds = array<i64: 64, 64>}, {pipeline_mode = #tpu.pipeline_mode<synchronous>, transform_indices = @transform_3, window_bounds = array<i64: 1, 64>}, {transform_indices = @transform_4, window_bounds = array<i64: 1, 8, 64>}]} {
    %c0_i32 = arith.constant 0 : i32
    %0 = arith.cmpi eq, %arg1, %c0_i32 : i32
    %1 = arith.extui %0 : i1 to i32
    %c0_i32_0 = arith.constant 0 : i32
    %2 = arith.cmpi ne, %1, %c0_i32_0 : i32
    scf.if %2 {
      %c0_36 = arith.constant 0 : index
      %c0_37 = arith.constant 0 : index
      %c0_38 = arith.constant 0 : index
      %96 = vector.load %arg2[%c0_36, %c0_37, %c0_38] : memref<1x8x64xbf16, #tpu.memory_space<vmem>>, vector<1x8x64xbf16>
      %97 = vector.shape_cast %96 : vector<1x8x64xbf16> to vector<8x64xbf16>
      %c0_39 = arith.constant 0 : index
      %c0_40 = arith.constant 0 : index
      %98 = vector.load %arg3[%c0_39, %c0_40] : memref<64x192xbf16, #tpu.memory_space<vmem>>, vector<64x192xbf16>
      %cst_41 = arith.constant dense<0.000000e+00> : vector<8x192xf32>
      %99 = tpu.matmul %97, %98, %cst_41 {dimension_numbers = #tpu.dot_dimension_numbers<[1], [0], [0], [1], [0, 0, 1, 1], [], []>} : vector<8x64xbf16>, vector<64x192xbf16>, vector<8x192xf32> -> vector<8x192xf32>
      %100 = arith.truncf %99 : vector<8x192xf32> to vector<8x192xbf16>
      %c0_42 = arith.constant 0 : index
      %c0_43 = arith.constant 0 : index
      %101 = vector.load %arg7[%c0_42, %c0_43] : memref<8x192xbf16, #tpu.memory_space<vmem>>, vector<8x192xbf16>
      tpu.vector_store %arg7[%c0_42, %c0_43], %100 {strides = array<i32>} : memref<8x192xbf16, #tpu.memory_space<vmem>>, vector<8x192xbf16>,
    } else {
    }
    %c8_i32 = arith.constant 8 : i32
    %3 = arith.muli %arg1, %c8_i32 : i32
    %4 = tpu.assume_multiple %3, 8 : i32
    %5 = tpu.iota {dimensions = array<i32: 0>} : vector<8x8xi32>
    %6 = vector.broadcast %4 : i32 to vector<8x8xi32>
    %7 = arith.addi %6, %5 : vector<8x8xi32>
    %8 = tpu.iota {dimensions = array<i32: 1>} : vector<8x8xi32>
    %9 = arith.cmpi sgt, %8, %7 : vector<8x8xi32>
    %10 = arith.index_cast %4 : i32 to index
    %c0 = arith.constant 0 : index
    %11 = vector.load %arg7[%10, %c0] : memref<8x192xbf16, #tpu.memory_space<vmem>>, vector<8x16xbf16>
    %c0_1 = arith.constant 0 : index
    %c64 = arith.constant 64 : index
    %12 = vector.load %arg7[%c0_1, %c64] : memref<8x192xbf16, #tpu.memory_space<vmem>>, vector<8x16xbf16>
    %c0_2 = arith.constant 0 : index
    %c128 = arith.constant 128 : index
    %13 = vector.load %arg7[%c0_2, %c128] : memref<8x192xbf16, #tpu.memory_space<vmem>>, vector<8x16xbf16>
    %cst = arith.constant dense<0.000000e+00> : vector<8x8xf32>
    %14 = tpu.matmul %11, %12, %cst {dimension_numbers = #tpu.dot_dimension_numbers<[1], [1], [0], [0], [0, 0, 1, 0], [], []>} : vector<8x16xbf16>, vector<8x16xbf16>, vector<8x8xf32> -> vector<8x8xf32>
    %cst_3 = arith.constant -1.000000e+30 : f32
    %15 = vector.broadcast %cst_3 : f32 to vector<8x8xf32>
    %16 = arith.select %9, %15, %14 : vector<8x8xi1>, vector<8x8xf32>
    %cst_4 = arith.constant dense<0xFF800000> : vector<8xf32>
    %17 = vector.multi_reduction <maximumf>, %16, %cst_4 [1] : vector<8x8xf32> to vector<8xf32>
    %18 = vector.shape_cast %17 : vector<8xf32> to vector<8x1xf32>
    %19 = vector.broadcast %18 : vector<8x1xf32> to vector<8x8xf32>
    %20 = arith.subf %16, %19 : vector<8x8xf32>
    %21 = math.exp %20 : vector<8x8xf32>
    %cst_5 = arith.constant dense<0.000000e+00> : vector<8xf32>
    %22 = vector.multi_reduction <add>, %21, %cst_5 [1] : vector<8x8xf32> to vector<8xf32>
    %23 = vector.shape_cast %22 : vector<8xf32> to vector<8x1xf32>
    %24 = tpu.reciprocal %23 {approx = true} : vector<8x1xf32> -> vector<8x1xf32>
    %25 = vector.broadcast %24 : vector<8x1xf32> to vector<8x8xf32>
    %26 = arith.mulf %21, %25 : vector<8x8xf32>
    %27 = arith.truncf %26 : vector<8x8xf32> to vector<8x8xbf16>
    %cst_6 = arith.constant dense<0.000000e+00> : vector<8x16xf32>
    %28 = tpu.matmul %27, %13, %cst_6 {dimension_numbers = #tpu.dot_dimension_numbers<[1], [0], [0], [1], [0, 0, 1, 1], [], []>} : vector<8x8xbf16>, vector<8x16xbf16>, vector<8x16xf32> -> vector<8x16xf32>
    %29 = arith.index_cast %4 : i32 to index
    %c16 = arith.constant 16 : index
    %30 = vector.load %arg7[%29, %c16] : memref<8x192xbf16, #tpu.memory_space<vmem>>, vector<8x16xbf16>
    %c0_7 = arith.constant 0 : index
    %c80 = arith.constant 80 : index
    %31 = vector.load %arg7[%c0_7, %c80] : memref<8x192xbf16, #tpu.memory_space<vmem>>, vector<8x16xbf16>
    %c0_8 = arith.constant 0 : index
    %c144 = arith.constant 144 : index
    %32 = vector.load %arg7[%c0_8, %c144] : memref<8x192xbf16, #tpu.memory_space<vmem>>, vector<8x16xbf16>
    %cst_9 = arith.constant dense<0.000000e+00> : vector<8x8xf32>
    %33 = tpu.matmul %30, %31, %cst_9 {dimension_numbers = #tpu.dot_dimension_numbers<[1], [1], [0], [0], [0, 0, 1, 0], [], []>} : vector<8x16xbf16>, vector<8x16xbf16>, vector<8x8xf32> -> vector<8x8xf32>
    %cst_10 = arith.constant -1.000000e+30 : f32
    %34 = vector.broadcast %cst_10 : f32 to vector<8x8xf32>
    %35 = arith.select %9, %34, %33 : vector<8x8xi1>, vector<8x8xf32>
    %cst_11 = arith.constant dense<0xFF800000> : vector<8xf32>
    %36 = vector.multi_reduction <maximumf>, %35, %cst_11 [1] : vector<8x8xf32> to vector<8xf32>
    %37 = vector.shape_cast %36 : vector<8xf32> to vector<8x1xf32>
    %38 = vector.broadcast %37 : vector<8x1xf32> to vector<8x8xf32>
    %39 = arith.subf %35, %38 : vector<8x8xf32>
    %40 = math.exp %39 : vector<8x8xf32>
    %cst_12 = arith.constant dense<0.000000e+00> : vector<8xf32>
    %41 = vector.multi_reduction <add>, %40, %cst_12 [1] : vector<8x8xf32> to vector<8xf32>
    %42 = vector.shape_cast %41 : vector<8xf32> to vector<8x1xf32>
    %43 = tpu.reciprocal %42 {approx = true} : vector<8x1xf32> -> vector<8x1xf32>
    %44 = vector.broadcast %43 : vector<8x1xf32> to vector<8x8xf32>
    %45 = arith.mulf %40, %44 : vector<8x8xf32>
    %46 = arith.truncf %45 : vector<8x8xf32> to vector<8x8xbf16>
    %cst_13 = arith.constant dense<0.000000e+00> : vector<8x16xf32>
    %47 = tpu.matmul %46, %32, %cst_13 {dimension_numbers = #tpu.dot_dimension_numbers<[1], [0], [0], [1], [0, 0, 1, 1], [], []>} : vector<8x8xbf16>, vector<8x16xbf16>, vector<8x16xf32> -> vector<8x16xf32>
    %48 = arith.index_cast %4 : i32 to index
    %c32 = arith.constant 32 : index
    %49 = vector.load %arg7[%48, %c32] : memref<8x192xbf16, #tpu.memory_space<vmem>>, vector<8x16xbf16>
    %c0_14 = arith.constant 0 : index
    %c96 = arith.constant 96 : index
    %50 = vector.load %arg7[%c0_14, %c96] : memref<8x192xbf16, #tpu.memory_space<vmem>>, vector<8x16xbf16>
    %c0_15 = arith.constant 0 : index
    %c160 = arith.constant 160 : index
    %51 = vector.load %arg7[%c0_15, %c160] : memref<8x192xbf16, #tpu.memory_space<vmem>>, vector<8x16xbf16>
    %cst_16 = arith.constant dense<0.000000e+00> : vector<8x8xf32>
    %52 = tpu.matmul %49, %50, %cst_16 {dimension_numbers = #tpu.dot_dimension_numbers<[1], [1], [0], [0], [0, 0, 1, 0], [], []>} : vector<8x16xbf16>, vector<8x16xbf16>, vector<8x8xf32> -> vector<8x8xf32>
    %cst_17 = arith.constant -1.000000e+30 : f32
    %53 = vector.broadcast %cst_17 : f32 to vector<8x8xf32>
    %54 = arith.select %9, %53, %52 : vector<8x8xi1>, vector<8x8xf32>
    %cst_18 = arith.constant dense<0xFF800000> : vector<8xf32>
    %55 = vector.multi_reduction <maximumf>, %54, %cst_18 [1] : vector<8x8xf32> to vector<8xf32>
    %56 = vector.shape_cast %55 : vector<8xf32> to vector<8x1xf32>
    %57 = vector.broadcast %56 : vector<8x1xf32> to vector<8x8xf32>
    %58 = arith.subf %54, %57 : vector<8x8xf32>
    %59 = math.exp %58 : vector<8x8xf32>
    %cst_19 = arith.constant dense<0.000000e+00> : vector<8xf32>
    %60 = vector.multi_reduction <add>, %59, %cst_19 [1] : vector<8x8xf32> to vector<8xf32>
    %61 = vector.shape_cast %60 : vector<8xf32> to vector<8x1xf32>
    %62 = tpu.reciprocal %61 {approx = true} : vector<8x1xf32> -> vector<8x1xf32>
    %63 = vector.broadcast %62 : vector<8x1xf32> to vector<8x8xf32>
    %64 = arith.mulf %59, %63 : vector<8x8xf32>
    %65 = arith.truncf %64 : vector<8x8xf32> to vector<8x8xbf16>
    %cst_20 = arith.constant dense<0.000000e+00> : vector<8x16xf32>
    %66 = tpu.matmul %65, %51, %cst_20 {dimension_numbers = #tpu.dot_dimension_numbers<[1], [0], [0], [1], [0, 0, 1, 1], [], []>} : vector<8x8xbf16>, vector<8x16xbf16>, vector<8x16xf32> -> vector<8x16xf32>
    %67 = arith.index_cast %4 : i32 to index
    %c48 = arith.constant 48 : index
    %68 = vector.load %arg7[%67, %c48] : memref<8x192xbf16, #tpu.memory_space<vmem>>, vector<8x16xbf16>
    %c0_21 = arith.constant 0 : index
    %c112 = arith.constant 112 : index
    %69 = vector.load %arg7[%c0_21, %c112] : memref<8x192xbf16, #tpu.memory_space<vmem>>, vector<8x16xbf16>
    %c0_22 = arith.constant 0 : index
    %c176 = arith.constant 176 : index
    %70 = vector.load %arg7[%c0_22, %c176] : memref<8x192xbf16, #tpu.memory_space<vmem>>, vector<8x16xbf16>
    %cst_23 = arith.constant dense<0.000000e+00> : vector<8x8xf32>
    %71 = tpu.matmul %68, %69, %cst_23 {dimension_numbers = #tpu.dot_dimension_numbers<[1], [1], [0], [0], [0, 0, 1, 0], [], []>} : vector<8x16xbf16>, vector<8x16xbf16>, vector<8x8xf32> -> vector<8x8xf32>
    %cst_24 = arith.constant -1.000000e+30 : f32
    %72 = vector.broadcast %cst_24 : f32 to vector<8x8xf32>
    %73 = arith.select %9, %72, %71 : vector<8x8xi1>, vector<8x8xf32>
    %cst_25 = arith.constant dense<0xFF800000> : vector<8xf32>
    %74 = vector.multi_reduction <maximumf>, %73, %cst_25 [1] : vector<8x8xf32> to vector<8xf32>
    %75 = vector.shape_cast %74 : vector<8xf32> to vector<8x1xf32>
    %76 = vector.broadcast %75 : vector<8x1xf32> to vector<8x8xf32>
    %77 = arith.subf %73, %76 : vector<8x8xf32>
    %78 = math.exp %77 : vector<8x8xf32>
    %cst_26 = arith.constant dense<0.000000e+00> : vector<8xf32>
    %79 = vector.multi_reduction <add>, %78, %cst_26 [1] : vector<8x8xf32> to vector<8xf32>
    %80 = vector.shape_cast %79 : vector<8xf32> to vector<8x1xf32>
    %81 = tpu.reciprocal %80 {approx = true} : vector<8x1xf32> -> vector<8x1xf32>
    %82 = vector.broadcast %81 : vector<8x1xf32> to vector<8x8xf32>
    %83 = arith.mulf %78, %82 : vector<8x8xf32>
    %84 = arith.truncf %83 : vector<8x8xf32> to vector<8x8xbf16>
    %cst_27 = arith.constant dense<0.000000e+00> : vector<8x16xf32>
    %85 = tpu.matmul %84, %70, %cst_27 {dimension_numbers = #tpu.dot_dimension_numbers<[1], [0], [0], [1], [0, 0, 1, 1], [], []>} : vector<8x8xbf16>, vector<8x16xbf16>, vector<8x16xf32> -> vector<8x16xf32>
    %86 = tpu.concatenate %28, %47, %66, %85 in 1 : vector<8x16xf32>, vector<8x16xf32>, vector<8x16xf32>, vector<8x16xf32> -> vector<8x64xf32>
    %87 = arith.truncf %86 : vector<8x64xf32> to vector<8x64xbf16>
    %c0_28 = arith.constant 0 : index
    %c0_29 = arith.constant 0 : index
    %88 = vector.load %arg4[%c0_28, %c0_29] : memref<64x64xbf16, #tpu.memory_space<vmem>>, vector<64x64xbf16>
    %cst_30 = arith.constant dense<0.000000e+00> : vector<8x64xf32>
    %89 = tpu.matmul %87, %88, %cst_30 {dimension_numbers = #tpu.dot_dimension_numbers<[1], [0], [0], [1], [0, 0, 1, 1], [], []>} : vector<8x64xbf16>, vector<64x64xbf16>, vector<8x64xf32> -> vector<8x64xf32>
    %c0_31 = arith.constant 0 : index
    %c0_32 = arith.constant 0 : index
    %90 = vector.load %arg5[%c0_31, %c0_32] : memref<1x64xf32, #tpu.memory_space<vmem>>, vector<1x64xf32>
    %91 = vector.broadcast %90 : vector<1x64xf32> to vector<8x64xf32>
    %92 = arith.addf %89, %91 : vector<8x64xf32>
    %c0_33 = arith.constant 0 : index
    %c0_34 = arith.constant 0 : index
    %c0_35 = arith.constant 0 : index
    %93 = vector.load %arg6[%c0_33, %c0_34, %c0_35] : memref<1x8x64xf32, #tpu.memory_space<vmem>>, vector<1x8x64xf32>
    %94 = vector.shape_cast %93 : vector<1x8x64xf32> to vector<8x64xf32>
    %95 = vector.shape_cast %92 : vector<8x64xf32> to vector<1x8x64xf32>
    tpu.vector_store %arg6[%c0_33, %c0_34, %c0_35], %95 {strides = array<i32>} : memref<1x8x64xf32, #tpu.memory_space<vmem>>, vector<1x8x64xf32>,
    return
  }
  func.func @transform_0(%arg0: i32, %arg1: i32) -> (i32, i32, i32) {
    %c0_i32 = arith.constant 0 : i32
    %c0_i32_0 = arith.constant 0 : i32
    %c0_i32_1 = arith.constant 0 : i32
    return %arg0, %c0_i32, %c0_i32_0 : i32, i32, i32
  }
  func.func @transform_1(%arg0: i32, %arg1: i32) -> (i32, i32) {
    %c0_i32 = arith.constant 0 : i32
    %c0_i32_0 = arith.constant 0 : i32
    %c0_i32_1 = arith.constant 0 : i32
    return %c0_i32, %c0_i32_0 : i32, i32
  }
  func.func @transform_2(%arg0: i32, %arg1: i32) -> (i32, i32) {
    %c0_i32 = arith.constant 0 : i32
    %c0_i32_0 = arith.constant 0 : i32
    %c0_i32_1 = arith.constant 0 : i32
    return %c0_i32, %c0_i32_0 : i32, i32
  }
  func.func @transform_3(%arg0: i32, %arg1: i32) -> (i32, i32) {
    %c0_i32 = arith.constant 0 : i32
    %c0_i32_0 = arith.constant 0 : i32
    %c0_i32_1 = arith.constant 0 : i32
    return %c0_i32, %c0_i32_0 : i32, i32
  }
  func.func @transform_4(%arg0: i32, %arg1: i32) -> (i32, i32, i32) {
    %c0_i32 = arith.constant 0 : i32
    %c0_i32_0 = arith.constant 0 : i32
    return %arg0, %arg1, %c0_i32 : i32, i32, i32
  }
}

</mosaic_0001>

<bundles_post_ra>
// kernel: tpu_custom_call.1
= control target key start
LH: loop header
LB: loop body
LE: loop exit
PB: predicated region body
PF: predicated region fallthrough
CT: control target
= control target key end

     0   :  { %9 = vsyncpa [#allocation4], 0  ;;  %s1878_s0 = inlined_call_operand.hbm [shape: bf16[2,8,64], index: 0, kind: input, shape index: {}]   ;;  %s1879_s1 = inlined_call_operand.hbm [shape: bf16[64,192], index: 1, kind: input, shape index: {}]   ;;  %s1880_s2 = inlined_call_operand.hbm [shape: bf16[64,64], index: 2, kind: input, shape index: {}]   ;;  %s1881_s3 = inlined_call_operand.vmem [shape: f32[1,64], index: 3, kind: input, shape index: {}]   ;;  %s1882_s4 = inlined_call_operand.hbm [shape: f32[2,8,64], index: 4, kind: output, shape index: {}]  }
   0x1   :  { %11 = vsyncpa [#allocation4 + $0x1], 0 }
   0x2   :  { %12 = vsyncpa [#allocation7], 0 }
   0x3   :  { %13 = vsyncpa [#allocation5], 0 }
   0x4   :  { %15 = vsyncpa [#allocation5 + $0x1], 0  ;;  %s1527_s15 = smov 0   ;;  %s1529_s16 = smov 0  }
   0x5   :  { %s1531_s17 = smov 0   ;;  %s1533_s18 = smov 0  }
   0x6   :  { %s1535_s19 = smov 0   ;;  %s1537_s20 = smov 0  }
   0x7 LB: > { %s1052_s21 = sadd.s32 4294967295, %s1482_s20   ;;  %s1053_s22 = sadd.s32 4294967294, %s1482_s20   ;;  %s1482_s20 = sphi %s1537_s20, %s21_s20   ;;  %s1478_s19 = sphi %s1535_s19, %s1904_s19   ;;  %s1474_s18 = sphi %s1533_s18, %s1903_s18   ;;  %s1470_s17 = sphi %s1531_s17, %s1902_s17   ;;  %s1466_s16 = sphi %s1529_s16, %s1901_s16   ;;  %s1462_s15 = sphi %s1527_s15, %s1900_s15  }
   0x8   : > { %p53_p0 = scmp.ne.s32.totalorder %s1466_s16, %s1462_s15  ;;  %p1561_p1 = scmp.eq.s32.totalorder %s1052_s21, 0 }
   0x9   : > { %p1565_p2 = scmp.eq.s32.totalorder %s1052_s21, 1  ;;  %p148_p3 = scmp.eq.s32.totalorder %s1053_s22, 1 }
   0xa   : > { %s1887_s23 = scalar_select %p1561_p1, 1, 0 }
   0xb   : > { %p1571_p4 = por %p1561_p1, %p53_p0  ;;  %p1054_p5 = scmp.ge.s32.totalorder %s1482_s20, 1 }
   0xc   : > { %p1576_p6 = por %p148_p3, %p53_p0  ;;  %p155_p7 = scmp.lt.s32.totalorder %s1482_s20, 3 }
   0xd   : > { %s1889_s25 = scalar_select %p1571_p4, 1, 0 }
   0xe   : > { %s1890_s26 = scalar_select %p1576_p6, 1, 0 }
   0xf   : > { %p1581_p8 = pnand %p1054_p5, %p155_p7  ;;  %s1484_s28 = smov [#allocation6]  }
  0x10   : > { %s167_s29 = sshll.u32 %s1484_s28, 4  ;;  %s1485_s5 = smov [#allocation8]   ;;  %s1585_s29 = int_to_ptr.vmem [resolvable:$true] %s167_s29 }
  0x11   : > { %p1190_p9 = pneg %p1581_p8  ;;  %s180_s6 = sshll.u32 %s1485_s5, 4  ;;  %s1596_s6 = int_to_ptr.vmem [resolvable:$true] %s180_s6 }
  0x12   : > { %s1310_s9 = scalar_lea.hbm %s1879_s1, 1024 }
  0x13   : > { %p1592_p11 = pnand %p1190_p9, %p1561_p1  ;;  %p1311_p12 = scmp.ne.s32.totalorder %s1879_s1, %s1310_s9 }
  0x14   : > { %p1317_p5 = scmp.lt.u32.totalorder %s1310_s9, %s1879_s1 }
  0x15   : > { %p1312_p13 = pneg %p1592_p11 }
  0x17   : > { %p1313_p0 = pnand %p1312_p13, %p1311_p12 }
  0x19   : > { %p1314_p3 = pneg %p1313_p0 }
  0x1b   : > { %p1319_p7 = pnand %p1317_p5, %p1314_p3 }
  0x1d   : > { %1322 = shalt.err (!%p1319_p7)
}
  0x1e   : > { %s1323_s14 = scalar_lea.vmem %s1585_s29, 1024  ;;  %p1331_p1 = scmp.lt.s32.totalorder %s1585_s29, %s1585_s29 }
  0x1f   : > { %p1324_p9 = scmp.ne.s32.totalorder %s1585_s29, %s1323_s14  ;;  %p1332_p12 = scmp.lt.s32.totalorder %s1323_s14, %s1323_s14 }
  0x21   : > { %p1326_p10 = pnand %p1324_p9, %p1312_p13  ;;  %p1333_p0 = por %p1332_p12, %p1331_p1 }
  0x23   : > { %p1327_p6 = pneg %p1326_p10 }
  0x25   : > { %p1334_p4 = pnand %p1333_p0, %p1327_p6 }
  0x27   : > { %1337 = shalt.err (!%p1334_p4)
}
  0x28   : > { %s1486_s21 = smov 128   ;;  %s1487_s22 = smov 8  }
  0x29   : > { %1193 = dma.hbm_to_vmem [thread:$0]  (!%p1592_p11), %s1879_s1, 1024, %s1585_s29, [#allocation7], %s1486_s21, %s1486_s21, %s1487_s22  }
  0x2a   : > { %s1338_s9 = scalar_lea.hbm %s1880_s2, 512 }
  0x2b   : > { %p1339_p1 = scmp.ne.s32.totalorder %s1880_s2, %s1338_s9  ;;  %p1345_p10 = scmp.lt.u32.totalorder %s1338_s9, %s1880_s2 }
  0x2d   : > { %p1341_p4 = pnand %p1339_p1, %p1312_p13 }
  0x2f   : > { %p1342_p6 = pneg %p1341_p4 }
  0x31   : > { %p1347_p3 = pnand %p1345_p10, %p1342_p6 }
  0x33   : > { %1350 = shalt.err (!%p1347_p3)
}
  0x34   : > { %s1351_s29 = scalar_lea.vmem %s1596_s6, 512  ;;  %p1359_p12 = scmp.lt.s32.totalorder %s1596_s6, %s1596_s6 }
  0x35   : > { %p1352_p5 = scmp.ne.s32.totalorder %s1596_s6, %s1351_s29  ;;  %p1360_p0 = scmp.lt.s32.totalorder %s1351_s29, %s1351_s29 }
  0x37   : > { %p1354_p7 = pnand %p1352_p5, %p1312_p13  ;;  %p1361_p1 = por %p1360_p0, %p1359_p12 }
  0x39   : > { %p1355_p9 = pneg %p1354_p7 }
  0x3b   : > { %p1362_p4 = pnand %p1361_p1, %p1355_p9 }
  0x3d   : > { %1365 = shalt.err (!%p1362_p4)
}
  0x3e   : > { %s1488_s14 = smov 64   ;;  %s1489_s21 = smov 4  }
  0x3f   : > { %1196 = dma.hbm_to_vmem [thread:$0]  (!%p1592_p11), %s1880_s2, 512, %s1596_s6, [#allocation7], %s1488_s14, %s1488_s14, %s1489_s21  }
  0x40   : > { %s33_s5 = sadd.s32 1, %s1478_s19  ;;  %s40_s7 = sadd.s32 1, %s1470_s17 }
  0x41   : > { %p35_p13 = scmp.ge.s32.totalorder %s33_s5, 2  ;;  %p47_p6 = scmp.ne.s32.totalorder %s1470_s17, %s1466_s16 }
  0x42   : > { %p48_p10 = scmp.eq.s32.totalorder %s1482_s20, 0  ;;  %p1207_p3 = scmp.lt.s32.totalorder %s1482_s20, 2 }
  0x43   : > { %s1906_s5 = smov (%p35_p13, %s33_s5), 0  ;;  %p1660_p7 = por %p1565_p2, %p47_p6 }
  0x44   : > { %p49_p5 = por %p48_p10, %p47_p6  ;;  %s37_s30 = ssub.s32 %s1478_s19, %s1906_s5 }
  0x45   : > { %s1893_s8 = scalar_select %p1660_p7, 1, 0 }
  0x46   : > { %s197_s9 = sand.u32 1, %s1470_s17   ;;  %p38_p9 = scmp.eq.s32.totalorder %s37_s30, 0 }
  0x47   : > { %s1058_s6 = sshll.u32 %s197_s9, 2  ;;  %s1059_s10 = sshll.u32 %s1478_s19, 6 }
  0x48   : > { %s1669_s11 = scalar_select %p38_p9, %s1470_s17, %s40_s7  }
  0x49   : > { %s1674_s29 = scalar_lea.hbm %s1878_s0, %s1059_s10  ;;  %s201_s24 = scalar_lea.vmem [#allocation3], %s1058_s6 }
  0x4a   : > { %s208_s14 = sshll.u32 %s201_s24, 4  ;;  %p1678_p2 = pnand %p1207_p3, %p49_p5  ;;  %s1682_s14 = int_to_ptr.vmem [resolvable:$true] %s208_s14 }
  0x4b   : > { %s198_s22 = scalar_lea.sflag [#allocation4], %s197_s9  ;;  %s1366_s28 = scalar_lea.hbm %s1674_s29, 64 }
  0x4c   : > { %p1367_p11 = scmp.ne.s32.totalorder %s1674_s29, %s1366_s28  ;;  %p1368_p12 = pneg %p1678_p2 }
  0x4d   : > { %s1371_s6 = scalar_lea.hbm %s1878_s0, 128  ;;  %p1372_p4 = scmp.lt.u32.totalorder %s1674_s29, %s1878_s0 }
  0x4e   : > { %p1369_p0 = pnand %p1368_p12, %p1367_p11  ;;  %p1373_p13 = scmp.lt.u32.totalorder %s1371_s6, %s1366_s28 }
  0x4f   : > { %p1375_p10 = scmp.lt.u32.totalorder %s1366_s28, %s1674_s29 }
  0x50   : > { %p1370_p1 = pneg %p1369_p0  ;;  %p1374_p6 = por %p1373_p13, %p1372_p4 }
  0x52   : > { %p1376_p3 = por %p1375_p10, %p1374_p6 }
  0x54   : > { %p1377_p5 = pnand %p1376_p3, %p1370_p1 }
  0x56   : > { %1380 = shalt.err (!%p1377_p5)
}
  0x57   : > { %s1381_s9 = scalar_lea.vmem %s1682_s14, 64  ;;  %s1490_s13 = smov [#allocation3]  }
  0x58   : > { %p1382_p9 = scmp.ne.s32.totalorder %s1682_s14, %s1381_s9  ;;  %s1386_s24 = sshll.u32 %s1490_s13, 4  ;;  %s1387_s24 = int_to_ptr.vmem [resolvable:$false] %s1386_s24 }
  0x59   : > { %s1388_s7 = scalar_lea.vmem %s1387_s24, 128  ;;  %p1389_p7 = scmp.lt.s32.totalorder %s1682_s14, %s1387_s24 }
  0x5a   : > { %p1384_p11 = pnand %p1382_p9, %p1368_p12  ;;  %p1390_p4 = scmp.lt.s32.totalorder %s1388_s7, %s1381_s9 }
  0x5c   : > { %p1385_p0 = pneg %p1384_p11  ;;  %p1391_p13 = por %p1390_p4, %p1389_p7 }
  0x5e   : > { %p1392_p6 = pnand %p1391_p13, %p1385_p0 }
  0x60   : > { %1395 = shalt.err (!%p1392_p6)
}
  0x61   : > { %1200 = dma.hbm_to_vmem [thread:$0]  (!%p1678_p2), %s1674_s29, 64, %s1682_s14, %s198_s22  }
  0x62   : > { %217 = sbr.rel (%p1581_p8) target bundleno = 2120 (0x848), region = 36  ;;  %s1712_s28 = sand.u32 (!%p1581_p8), 1, %s1466_s16  }
  0x63   : > { %s1061_s30 = sshll.u32 (!%p1581_p8), %s1712_s28, 2  ;;  %s220_s6 = scalar_lea.sflag (!%p1581_p8), [#allocation4], %s1712_s28 }
  0x64   : > { %s223_s10 = scalar_lea.vmem (!%p1581_p8), [#allocation3], %s1061_s30  ;;  %p1895_p7 = scmp.ne.s32.totalorder (!%p1581_p8), %s1889_s25, 0 }
  0x69   : > { %1449 = dma.done.wait (%p1895_p7), %s220_s6, 64  }
  0x6a   : > { %1451 = vsyncadd (%p1895_p7), %s220_s6, 4294967232  ;;  %p1896_p12 = scmp.ne.s32.totalorder %s1887_s23, 0 }
  0x6c   : > { %1453 = dma.done.wait (%p1896_p12), [#allocation7], 1536  }
  0x6d   : > { %1455 = vsyncadd (%p1896_p12), [#allocation7], 4294965760  ;;  %v1491_v0 = vmov 0   ;;  %v1275_v1 = vld [vmem:[#allocation6 + $0x4] ss:$8 sps:$4 sm:$0xff]   ;;  %vm310_vm0 = vcmask 523264   ;;  %v368_v22 = vlaneseq }
  0x6e   : > { %346 = vmatprep.mubr.bf16.mxu0 %v1491_v0  ;;  %v1277_v2 = vld [vmem:[#allocation6] ss:$8 sps:$4 sm:$0xff]   ;;  %314 = vmatprep.subr.bf16.mxu0 %v1275_v1  ;;  %v1278_v3 = vld [vmem:[#allocation6 + $0x14] ss:$8 sps:$4 sm:$0xff]   ;;  %v1280_v4 = vld [vmem:[#allocation6 + $0x10] ss:$8 sps:$4 sm:$0xff]  }
  0x6f   : > { %315 = vmatpush1.bf16.msra.mxu0 %v1277_v2  ;;  %v1281_v5 = vld [vmem:[#allocation6 + $0x24] ss:$8 sps:$4 sm:$0xff]   ;;  %v1283_v6 = vld [vmem:[#allocation6 + $0x20] ss:$8 sps:$4 sm:$0xff]   ;;  %v1284_v7 = vld [vmem:[#allocation6 + $0x34] ss:$8 sps:$4 sm:$0xff]  }
  0x70   : > { %316 = vmatprep.subr.bf16.mxu0 %v1278_v3  ;;  %v1286_v8 = vld [vmem:[#allocation6 + $0x30] ss:$8 sps:$4 sm:$0xff]   ;;  %vm363_vm1 = vcmask 1043456   ;;  %vm364_vm2 = vcmask 523268   ;;  %v1492_v11 = vmov 0.0   ;;  %vm1493_vm4 = vmmov 0  }
  0x71   : > { %v261_v9 = vld [vmem:[%s223_s10] sm:$0xf]  ;;  %1118 = vmatprep.subr.bf16.mxu1 %v1492_v11  ;;  %vm365_vm3 = vmor %vm364_vm2, %vm363_vm1  ;;  %1120 = vmatprep.mubr.msk.bf16.mxu1 %vm1493_vm4, %v1492_v11  ;;  %s1494_s23 = smov 48   ;;  %s1495_s25 = smov 64   ;;  %vm388_vm5 = vcmask 130048   ;;  %v1743_v23 = vshrl.u32 %v368_v22, 7 }
  0x72   : > { %v1745_v24 = vand.u32 127, %v368_v22  ;;  %vm436_vm7 = vcmask 64512   ;;  %s1496_s27 = smov 80   ;;  %s1497_s29 = smov 112   ;;  %vm848_vm8 = vcmask 261120   ;;  %vm850_vm9 = vcmask 392192  }
  0x73   : > { %317 = vmatpush1.bf16.msra.mxu0 %v1280_v4  ;;  %s1498_s14 = smov 32   ;;  %s1499_s21 = smov 96  }
  0x74   : > { %318 = vmatprep.subr.bf16.mxu0 %v1281_v5  ;;  %vm374_vm6 = vcmp.gt.s32.totalorder %v1745_v24, %v1743_v23  ;;  %s1500_s22 = smov 16   ;;  %s1064_s12 = sshll.u32 %s1712_s28, 3 }
  0x75   : > { %s1093_s24 = sshll.u32 %s1474_s18, 7  ;;  %s255_s7 = scalar_lea.vmem [#allocation9], %s1064_s12 }
  0x76   : > { %s952_s30 = sshll.u32 %s255_s7, 4  ;;  %s938_s18 = scalar_lea.sflag [#allocation5], %s1712_s28  ;;  %s1830_s30 = int_to_ptr.vmem [resolvable:$true] %s952_s30 }
  0x77   : > { %319 = vmatpush1.bf16.msra.mxu0 %v1283_v6  ;;  %p1897_p2 = scmp.ne.s32.totalorder %s1893_s8, 0 }
  0x78   : > { %320 = vmatprep.subr.bf16.mxu0 %v1284_v7 }
  0x7b   : > { %321 = vmatpush1.bf16.msra.mxu0 %v1286_v8 }
  0x7c   : > { %1142 = vmatprep.subr.bf16.mxu0 %v1492_v11 }
  0x7e   : > { %1073 = vmatmul.mubr.msk.bf16.vlgmr.msra.gmra.mrb[0].mxu0 %vm310_vm0, %v261_v9 }
  0x7f   : > { %1144 = vmatprep.mubr.msk.bf16.mxu0 %vm1493_vm4, %v1492_v11 }
 0x151   : > { %v348_v10 = vpop.f32.mrb[0].mxu0 }
 0x152   : > { %v350_v12 = vpop.f32.mrb[1].mxu0 }
 0x153   : > { %v1096_v13 = vpack.c.bf16 %v350_v12, %v348_v10  ;;  %v352_v14 = vpop.f32.mrb[2].mxu0 }
 0x154   : > { %v353_v15 = vpop.f32.mrb[3].mxu0 }
 0x155   : > { %366 = vst.msk [vmem:[#allocation2] sm:$0xff] %vm365_vm3, %v1096_v13 }
 0x15c   : > { %v1287_v16 = vld [vmem:[#allocation2] ss:$0 sps:$4 sm:$0xff]   ;;  %v1735_v19 = vld [vmem:[#allocation2 + $0x4] sm:$0xf] }
 0x15d   : > { %501 = vrot.lane.b32.xlu1 %v1287_v16, %s1494_s23  ;;  %386 = vrot.lane.b32.xlu0 %v1287_v16, %s1495_s25  ;;  %v380_v20 = vld [vmem:[#allocation2] sm:$0xf]  ;;  %v454_v21 = vsel %vm363_vm1, %v1735_v19, 0  ;;  %v1080_v8 = vcombine.low %v1735_v19, %v1735_v19  ;;  %s1396_s25 = scalar_lea.vmem %s1830_s30, 128 }
 0x15e   : > { %v1078_v31 = vcombine.low %v380_v20, %v380_v20  ;;  %p1397_p8 = scmp.ne.s32.totalorder %s1830_s30, %s1396_s25 }
 0x160   : > { %p1398_p1 = pnand %p1397_p8, %p1897_p2 }
 0x162   : > { %p1399_p10 = pneg %p1398_p1 }
 0x1cf   : > { %v387_v17 = vpop.permute.xlu0 %386  ;;  %v502_v37 = vpop.permute.xlu1 %501 }
 0x1d0   : > { %v393_v18 = vsel %vm388_vm5, %v387_v17, 0  ;;  %v507_v46 = vsel %vm388_vm5, %v502_v37, 0 }
 0x1d1   : > { %1119 = vmatpush3.bf16.xpose.msra.mxu1 %v393_v18 }
 0x1d2   : > { %1124 = vmatprep.subr.bf16.mxu1 %v1492_v11 }
 0x1d8   : > { %1121 = vmatmul.mubr.msk.bf16.vlgmr.msra.gmra.mrb[0].mxu1 %vm388_vm5, %v380_v20 }
 0x1d9   : > { %1125 = vmatpush3.bf16.msra.mxu1 %v454_v21  ;;  %1126 = vmatprep.mubr.msk.bf16.mxu1 %vm1493_vm4, %v1492_v11 }
 0x1da   : > { %1130 = vmatprep.subr.bf16.mxu1 %v1492_v11 }
 0x2ab   : > { %v429_v25 = vpop.f32.mrb[0].mxu1 }
 0x2ac   : > { %v435_v26 = vsel %vm374_vm6, -1e+30, %v429_v25  ;;  %v1122_v27 = vpop.f32.mrb[1].mxu1 }
 0x2ad   : > { %v432_v28 = vpop.f32.mrb[2].mxu1  ;;  %v437_v29 = vsel %vm436_vm7, %v435_v26, -inf }
 0x2ae   : > { %438 = vmax.xlane.f32.xlu0 %v437_v29  ;;  %v1123_v30 = vpop.f32.mrb[3].mxu1 }
 0x2c4   : > { %724 = vrot.lane.b32.xlu0 %v1078_v31, %s1496_s27 }
 0x33b   : > { %v439_v32 = vpop.xlane.xlu0 %438 }
 0x33c   : > { %v440_v33 = vsub.f32 %v435_v26, %v439_v32 }
 0x33e   : > { %v441_v34 = vmul.f32 1.442695, %v440_v33 }
 0x33f   : > { %v725_v49 = vpop.permute.xlu0 %724 }
 0x340   : > { %1294 = vpow2.f32 %v441_v34 }
 0x34a   : > { %v1295_v35 = vpop.eup %1294 }
 0x34b   : > { %v443_v36 = vsel %vm436_vm7, %v1295_v35, 0.0 }
 0x34c   : > { %444 = vadd.xlane.f32.xlu1 %v443_v36 }
 0x35d   : > { %499 = vrot.lane.b32.xlu1 %v1078_v31, %s1497_s29 }
 0x361   : > { %615 = vrot.lane.b32.xlu1 %v1287_v16, %s1498_s14 }
 0x365   : > { %613 = vrot.lane.b32.xlu1 %v1078_v31, %s1499_s21 }
 0x369   : > { %726 = vrot.lane.b32.xlu1 %v1287_v16, %s1500_s22 }
 0x3d9   : > { %v445_v38 = vpop.xlane.xlu1 %444 }
 0x3da   : > { %1296 = vrcp.f32 %v445_v38 }
 0x3dd   : > { %v500_v39 = vpop.permute.xlu1 %499 }
 0x3e1   : > { %v616_v40 = vpop.permute.xlu1 %615 }
 0x3e2   : > { %v621_v41 = vsel %vm388_vm5, %v616_v40, 0 }
 0x3e3   : > { %1143 = vmatpush3.bf16.xpose.msra.mxu0 %v621_v41 }
 0x3e4   : > { %v1297_v42 = vpop.eup %1296  ;;  %1154 = vmatprep.subr.bf16.mxu0 %v1492_v11 }
 0x3e5   : > { %v447_v43 = vmul.f32 %v1297_v42, %v1295_v35  ;;  %v614_v44 = vpop.permute.xlu1 %613 }
 0x3e7   : > { %v448_v45 = vpack.c.bf16 %v447_v43, %v447_v43  ;;  %v1290_v43 = vld [vmem:[#allocation8] sm:$0xff]  }
 0x3e9   : > { %1127 = vmatmul.mubr.msk.bf16.vlgmr.msra.gmra.mrb[4].mxu1 %vm436_vm7, %v448_v45  ;;  %v727_v47 = vpop.permute.xlu1 %726  ;;  %v1292_v45 = vld [vmem:[#allocation8 + $0x10] sm:$0xff]  }
 0x3ea   : > { %1131 = vmatpush3.bf16.xpose.msra.mxu1 %v507_v46  ;;  %v732_v48 = vsel %vm388_vm5, %v727_v47, 0  ;;  %1145 = vmatmul.mubr.msk.bf16.vlgmr.msra.gmra.mrb[4].mxu0 %vm388_vm5, %v614_v44  ;;  %v1291_v44 = vld [vmem:[#allocation8 + $0x8] sm:$0xff]  }
 0x3eb   : > { %1155 = vmatpush3.bf16.xpose.msra.mxu0 %v732_v48  ;;  %1132 = vmatprep.mubr.msk.bf16.mxu1 %vm1493_vm4, %v1492_v11 }
 0x3ec   : > { %1156 = vmatprep.mubr.msk.bf16.mxu0 %vm1493_vm4, %v1492_v11  ;;  %1136 = vmatprep.subr.bf16.mxu1 %v1492_v11 }
 0x3ed   : > { %1166 = vmatprep.subr.bf16.mxu0 %v1492_v11 }
 0x3f1   : > { %1133 = vmatmul.mubr.msk.bf16.vlgmr.msra.gmra.mrb[8].mxu1 %vm388_vm5, %v500_v39 }
 0x3f2   : > { %1157 = vmatmul.mubr.msk.bf16.vlgmr.msra.gmra.mrb[8].mxu0 %vm388_vm5, %v725_v49  ;;  %1138 = vmatprep.mubr.msk.bf16.mxu1 %vm1493_vm4, %v1492_v11 }
 0x3f3   : > { %1174 = vmatprep.mubr.msk.bf16.mxu0 %vm1493_vm4, %v1492_v11  ;;  %1167 = vmatpush3.bf16.msra.mxu0 %v1290_v43 }
 0x3f4   : > { %1168 = vmatprep.subr.bf16.mxu0 %v1492_v11 }
 0x3f7   : > { %1169 = vmatpush3.bf16.msra.mxu0 %v1291_v44 }
 0x3f8   : > { %1170 = vmatprep.subr.bf16.mxu0 %v1492_v11 }
 0x3fb   : > { %1171 = vmatpush3.bf16.msra.mxu0 %v1292_v45 }
 0x3fc   : > { %1172 = vmatprep.subr.bf16.mxu0 %v1492_v11 }
 0x4bc   : > { %v1777_v50 = vpop.f32.mrb[4].mxu1 }
 0x4bd   : > { %v1128_v51 = vpop.f32.mrb[5].mxu1  ;;  %v657_v52 = vpop.f32.mrb[4].mxu0 }
 0x4be   : > { %v663_v53 = vsel %vm374_vm6, -1e+30, %v657_v52  ;;  %v493_v54 = vpop.f32.mrb[6].mxu1  ;;  %v1146_v55 = vpop.f32.mrb[5].mxu0  ;;  %v1293_v51 = vld [vmem:[#allocation8 + $0x18] sm:$0xff]  }
 0x4bf   : > { %v1129_v56 = vpop.f32.mrb[7].mxu1  ;;  %v660_v57 = vpop.f32.mrb[6].mxu0  ;;  %v664_v58 = vsel %vm436_vm7, %v663_v53, -inf  ;;  %1173 = vmatpush3.bf16.msra.mxu0 %v1293_v51 }
 0x4c0   : > { %665 = vmax.xlane.f32.xlu0 %v664_v58  ;;  %v1147_v59 = vpop.f32.mrb[7].mxu0 }
 0x4c4   : > { %v543_v60 = vpop.f32.mrb[8].mxu1 }
 0x4c5   : > { %v549_v61 = vsel %vm374_vm6, -1e+30, %v543_v60  ;;  %v1134_v62 = vpop.f32.mrb[9].mxu1  ;;  %v768_v63 = vpop.f32.mrb[8].mxu0 }
 0x4c6   : > { %v546_v0 = vpop.f32.mrb[10].mxu1  ;;  %v1158_v1 = vpop.f32.mrb[9].mxu0  ;;  %v550_v2 = vsel %vm436_vm7, %v549_v61, -inf  ;;  %v774_v3 = vsel %vm374_vm6, -1e+30, %v768_v63 }
 0x4c7   : > { %551 = vmax.xlane.f32.xlu1 %v550_v2  ;;  %v1135_v4 = vpop.f32.mrb[11].mxu1  ;;  %v771_v5 = vpop.f32.mrb[10].mxu0  ;;  %v775_v7 = vsel %vm436_vm7, %v774_v3, -inf  ;;  %v1086_v2 = vld [vmem:[%s1881_s3] ss:$0 sm:$0xff] }
 0x4c8   : > { %v1159_v6 = vpop.f32.mrb[11].mxu0 }
 0x4cb   : > { %776 = vmax.xlane.f32.xlu1 %v775_v7 }
 0x4d6   : > { %565 = vrot.lane.b32.xlu0 %v1080_v8, %s1497_s29 }
 0x54d   : > { %v666_v9 = vpop.xlane.xlu0 %665 }
 0x54e   : > { %v667_v10 = vsub.f32 %v663_v53, %v666_v9 }
 0x550   : > { %v668_v12 = vmul.f32 1.442695, %v667_v10 }
 0x551   : > { %v566_v13 = vpop.permute.xlu0 %565 }
 0x552   : > { %1298 = vpow2.f32 %v668_v12  ;;  %v571_v14 = vsel %vm363_vm1, %v566_v13, 0 }
 0x553   : > { %1137 = vmatpush3.bf16.msra.mxu1 %v571_v14 }
 0x554   : > { %v552_v15 = vpop.xlane.xlu1 %551  ;;  %1148 = vmatprep.subr.bf16.mxu1 %v1492_v11 }
 0x555   : > { %v553_v16 = vsub.f32 %v549_v61, %v552_v15 }
 0x557   : > { %v554_v20 = vmul.f32 1.442695, %v553_v16 }
 0x558   : > { %v777_v17 = vpop.xlane.xlu1 %776 }
 0x559   : > { %v778_v18 = vsub.f32 %v774_v3, %v777_v17 }
 0x55b   : > { %v779_v21 = vmul.f32 1.442695, %v778_v18 }
 0x55c   : > { %v1299_v22 = vpop.eup %1298 }
 0x55d   : > { %1300 = vpow2.f32 %v779_v21  ;;  %v670_v19 = vsel %vm436_vm7, %v1299_v22, 0.0 }
 0x55e   : > { %671 = vadd.xlane.f32.xlu1 %v670_v19  ;;  %1302 = vpow2.f32 %v554_v20 }
 0x567   : > { %v1301_v23 = vpop.eup %1300 }
 0x568   : > { %v781_v24 = vsel %vm436_vm7, %v1301_v23, 0.0  ;;  %v1303_v25 = vpop.eup %1302 }
 0x569   : > { %782 = vadd.xlane.f32.xlu1 %v781_v24  ;;  %v556_v26 = vsel %vm436_vm7, %v1303_v25, 0.0 }
 0x56d   : > { %557 = vadd.xlane.f32.xlu1 %v556_v26 }
 0x57e   : > { %676 = vrot.lane.b32.xlu1 %v1080_v8, %s1499_s21 }
 0x582   : > { %787 = vrot.lane.b32.xlu1 %v1080_v8, %s1496_s27  ;;  %s1501_s27 = smov [#allocation9]  }
 0x583   : > { %s1400_s29 = sshll.u32 %s1501_s27, 4  ;;  %s1401_s29 = int_to_ptr.vmem [resolvable:$false] %s1400_s29 }
 0x584   : > { %p1403_p3 = scmp.lt.s32.totalorder %s1830_s30, %s1401_s29 }
 0x5eb   : > { %v672_v27 = vpop.xlane.xlu1 %671 }
 0x5f6   : > { %v783_v28 = vpop.xlane.xlu1 %782 }
 0x5fa   : > { %v558_v29 = vpop.xlane.xlu1 %557 }
 0x5fb   : > { %1304 = vrcp.f32 %v558_v29 }
 0x5fc   : > { %1306 = vrcp.f32 %v672_v27 }
 0x5fd   : > { %1308 = vrcp.f32 %v783_v28 }
 0x5fe   : > { %v677_v32 = vpop.permute.xlu1 %676 }
 0x5ff   : > { %v682_v35 = vsel %vm363_vm1, %v677_v32, 0 }
 0x602   : > { %v788_v37 = vpop.permute.xlu1 %787 }
 0x603   : > { %v793_v40 = vsel %vm363_vm1, %v788_v37, 0 }
 0x605   : > { %v1305_v30 = vpop.eup %1304 }
 0x606   : > { %v560_v31 = vmul.f32 %v1305_v30, %v1303_v25  ;;  %v1307_v34 = vpop.eup %1306 }
 0x607   : > { %v674_v36 = vmul.f32 %v1307_v34, %v1299_v22  ;;  %v1309_v39 = vpop.eup %1308 }
 0x608   : > { %v561_v33 = vpack.c.bf16 %v560_v31, %v560_v31  ;;  %v785_v41 = vmul.f32 %v1309_v39, %v1301_v23 }
 0x609   : > { %v675_v38 = vpack.c.bf16 %v674_v36, %v674_v36 }
 0x60a   : > { %1139 = vmatmul.mubr.msk.bf16.vlgmr.msra.gmra.mrb[12].mxu1 %vm436_vm7, %v561_v33  ;;  %v786_v42 = vpack.c.bf16 %v785_v41, %v785_v41 }
 0x60b   : > { %1149 = vmatpush3.bf16.msra.mxu1 %v682_v35  ;;  %1150 = vmatprep.mubr.msk.bf16.mxu1 %vm1493_vm4, %v1492_v11 }
 0x60c   : > { %1160 = vmatprep.subr.bf16.mxu1 %v1492_v11 }
 0x612   : > { %1151 = vmatmul.mubr.msk.bf16.vlgmr.msra.gmra.mrb[16].mxu1 %vm436_vm7, %v675_v38 }
 0x613   : > { %1161 = vmatpush3.bf16.msra.mxu1 %v793_v40  ;;  %1162 = vmatprep.mubr.msk.bf16.mxu1 %vm1493_vm4, %v1492_v11 }
 0x61a   : > { %1163 = vmatmul.mubr.msk.bf16.vlgmr.msra.gmra.mrb[20].mxu1 %vm436_vm7, %v786_v42 }
 0x6dd   : > { %v607_v46 = vpop.f32.mrb[12].mxu1 }
 0x6de   : > { %836 = vrot.lane.b32.xlu0 %v607_v46, %s1500_s22  ;;  %v1140_v47 = vpop.f32.mrb[13].mxu1 }
 0x6df   : > { %v610_v48 = vpop.f32.mrb[14].mxu1 }
 0x6e0   : > { %v1141_v49 = vpop.f32.mrb[15].mxu1 }
 0x6e5   : > { %v718_v52 = vpop.f32.mrb[16].mxu1 }
 0x6e6   : > { %840 = vrot.lane.b32.xlu1 %v718_v52, %s1498_s14  ;;  %v1152_v53 = vpop.f32.mrb[17].mxu1  ;;  %s1402_s14 = scalar_lea.vmem %s1401_s29, 256 }
 0x6e7   : > { %v721_v54 = vpop.f32.mrb[18].mxu1  ;;  %p1404_p5 = scmp.lt.s32.totalorder %s1402_s14, %s1396_s25 }
 0x6e8   : > { %v1153_v55 = vpop.f32.mrb[19].mxu1 }
 0x6e9   : > { %p1405_p9 = por %p1404_p5, %p1403_p3 }
 0x6eb   : > { %p1406_p11 = pnand %p1405_p9, %p1399_p10 }
 0x6ed   : > { %v829_v56 = vpop.f32.mrb[20].mxu1 }
 0x6ee   : > { %844 = vrot.lane.b32.xlu0 %v829_v56, %s1494_s23  ;;  %v1164_v57 = vpop.f32.mrb[21].mxu1  ;;  %s1828_s23 = scalar_lea.hbm %s1882_s4, %s1093_s24 }
 0x6ef   : > { %v832_v58 = vpop.f32.mrb[22].mxu1 }
 0x6f0   : > { %v1165_v59 = vpop.f32.mrb[23].mxu1 }
 0x750   : > { %v837_v60 = vpop.permute.xlu0 %836 }
 0x751   : > { %v847_v61 = vsel %vm388_vm5, %v1777_v50, %v837_v60 }
 0x758   : > { %v841_v11 = vpop.permute.xlu1 %840 }
 0x759   : > { %v849_v62 = vsel %vm848_vm8, %v847_v61, %v841_v11 }
 0x760   : > { %v845_v63 = vpop.permute.xlu0 %844 }
 0x761   : > { %v851_v0 = vsel %vm850_vm9, %v849_v62, %v845_v63 }
 0x762   : > { %v852_v1 = vpack.c.bf16 %v851_v0, %v851_v0 }
 0x764   : > { %1175 = vmatmul.mubr.msk.bf16.vlgmr.msra.gmra.mrb[12].mxu0 %vm310_vm0, %v852_v1 }
 0x837   : > { %v930_v3 = vpop.f32.mrb[12].mxu0 }
 0x838   : > { %v931_v4 = vadd.f32 %v1086_v2, %v930_v3  ;;  %v1176_v5 = vpop.f32.mrb[13].mxu0 }
 0x839   : > { %v933_v50 = vpop.f32.mrb[14].mxu0 }
 0x83a   : > { %v1177_v6 = vpop.f32.mrb[15].mxu0  ;;  %936 = vst.msk [vmem:[%s255_s7] sm:$0xff] %vm310_vm0, %v931_v4 }
 0x83b   : > { %1409 = shalt.err (!%p1406_p11)
}
 0x83c   : > { %s1410_s28 = scalar_lea.hbm %s1828_s23, 128  ;;  %s1414_s12 = scalar_lea.hbm %s1882_s4, 256 }
 0x83d   : > { %p1411_p0 = scmp.ne.s32.totalorder %s1828_s23, %s1410_s28  ;;  %p1415_p6 = scmp.lt.u32.totalorder %s1828_s23, %s1882_s4 }
 0x83e   : > { %p1416_p7 = scmp.lt.u32.totalorder %s1414_s12, %s1410_s28  ;;  %p1418_p8 = scmp.lt.u32.totalorder %s1410_s28, %s1828_s23 }
 0x83f   : > { %p1412_p4 = pnand %p1411_p0, %p1897_p2 }
 0x840   : > { %p1417_p12 = por %p1416_p7, %p1415_p6 }
 0x841   : > { %p1413_p13 = pneg %p1412_p4 }
 0x842   : > { %p1419_p1 = por %p1418_p8, %p1417_p12 }
 0x844   : > { %p1420_p10 = pnand %p1419_p1, %p1413_p13 }
 0x846   : > { %1423 = shalt.err (!%p1420_p10)
}
 0x847   : > { %1188 = dma.vmem_to_hbm [thread:$0]  (%p1897_p2), %s1830_s30, 128, %s1828_s23, %s938_s18  }
 0x848 PF: > { %s964_s24 = sand.u32 1, %s1462_s15   ;;  %p1898_p3 = scmp.ne.s32.totalorder %s1890_s26, 0 }
 0x849   : > { %p1899_p5 = scmp.ge.s32.totalorder %s1482_s20, 2  ;;  %s965_s7 = scalar_lea.sflag [#allocation5], %s964_s24 }
 0x84b   : > { %p1202_p9 = pnand %p1899_p5, %p1898_p3 }
 0x84d   : > { %1457 = dma.done.wait (!%p1202_p9), %s965_s7, 128  }
 0x84e   : > { %1459 = vsyncadd (!%p1202_p9), %s965_s7, 4294967168  ;;  %s21_s20 = sadd.s32 1, %s1482_s20   ;;  %s1900_s15 = smov %s1466_s16 }
 0x84f   : > { %p18_p11 = scmp.ge.s32.totalorder %s21_s20, 4   ;;  %s1901_s16 = smov %s1470_s17 }
 0x850   : > { %s1902_s17 = smov %s1669_s11  ;;  %s1903_s18 = smov %s1478_s19 }
 0x851   : > { %s1904_s19 = smov %s1906_s5  ;;  %20 = sbr.rel (!%p18_p11) target bundleno = 7 (0x7), region = 94 }
 0x858   :  { %970 = vsyncpa [#allocation4], 1 }
 0x859   :  { %972 = vsyncpa [#allocation4 + $0x1], 1 }
 0x85a   :  { %973 = vsyncpa [#allocation7], 1 }
 0x85b   :  { %974 = vsyncpa [#allocation5], 1 }
 0x85c   :  { %976 = vsyncpa [#allocation5 + $0x1], 1 }

</bundles_post_ra>
